<compile_context>
chip_gen: v7x
topology: tpu7x:2x2x1
jax: 0.10.0
libtpu: 0.0.40
codegen_flags: <defaults>
</compile_context>

<pallas_src>
import jax
import jax.numpy as jnp
from jax.experimental import pallas as pl
from jax.experimental.pallas import tpu as pltpu


def _round_up(n, m):
    return ((n + m - 1) // m) * m


def _net_kernel(x_ref, w1_ref, b1_ref, wo_ref, bo_ref, out_ref):
    # x_ref:   (TB, F)  bf16  — batch tile (rows on sublanes)
    # w1_ref:  (H, F)   bf16  — fc1.weight in PyTorch (out, in) layout
    # b1_ref:  (H, 1)   f32   — fc1.bias as a column
    # wo_ref:  (H, 1)   f32   — output.weight^T as a column
    # bo_ref:  (1, 1)   f32   — output.bias, in SMEM
    # out_ref: (1, TB)  f32   — lane-dense: batch on the lane axis

    # fc1 in transposed form: h^T = W1 @ x^T -> (H, TB), f32 accumulate (MXU).
    z = jax.lax.dot_general(
        w1_ref[...], x_ref[...],
        dimension_numbers=(((1,), (1,)), ((), ())),
        preferred_element_type=jnp.float32,
    )
    z = z + b1_ref[...]                                  # (H,1) lane-broadcast
    h = pl.reciprocal(1.0 + jnp.exp(-z), approx=True)    # sigmoid via EUP
    # output layer: VPU multiply + XLU sublane reduce -> (1, TB) lane-dense.
    o = jnp.sum(h * wo_ref[...], axis=0, keepdims=True)
    out_ref[...] = o + bo_ref[0, 0]


def net_forward(x, w1, b1, wo, bo, *, block_rows=4096):
    """Forward pass of Net.

    x:  (B, F) f32      w1: (H, F) f32 (fc1.weight, PyTorch layout)
    b1: (H, 1) f32      wo: (H, 1) f32 (output.weight^T)
    bo: (1, 1) f32      returns (B, 1) f32
    """
    B, F = x.shape
    H = w1.shape[0]

    # Batch tile: multiple of 128 so the (1, TB) output block is lane-dense.
    # TB=4096 bf16 x-tile is 4096*F*2 bytes double-buffered — far below VMEM
    # even on v7x (64 MiB/TC), so no vmem_limit override is needed.
    block_rows = max(128, _round_up(block_rows, 128))
    tb = min(block_rows, _round_up(B, 128))
    b_pad = _round_up(B, tb)
    grid = b_pad // tb

    if b_pad != B:
        x = jnp.pad(x, ((0, b_pad - B), (0, 0)))
    x_bf16 = x.astype(jnp.bfloat16)
    w1_bf16 = w1.astype(jnp.bfloat16)

    out = pl.pallas_call(
        _net_kernel,
        out_shape=jax.ShapeDtypeStruct((grid, 1, tb), jnp.float32),
        grid=(grid,),
        in_specs=[
            pl.BlockSpec((tb, F), lambda i: (i, 0)),             # x: streamed
            pl.BlockSpec((H, F), lambda i: (0, 0)),              # w1: resident
            pl.BlockSpec((H, 1), lambda i: (0, 0)),              # b1: resident
            pl.BlockSpec((H, 1), lambda i: (0, 0)),              # wo: resident
            pl.BlockSpec(memory_space=pltpu.MemorySpace.SMEM),   # bo scalar
        ],
        out_specs=pl.BlockSpec((None, 1, tb), lambda i: (i, 0, 0)),
        compiler_params=pltpu.CompilerParams(
            dimension_semantics=("parallel",),   # v7x: 2 TCs split the batch
        ),
    )(x_bf16, w1_bf16, b1, wo, bo)

    # (grid, 1, tb) -> (b_pad, 1) -> drop padded rows.
    return out.reshape(b_pad, 1)[:B]


def init_params(key, num_features, hidden=10):
    """Deterministic init mimicking nn.Linear's U(-1/sqrt(fan_in), 1/sqrt(fan_in))."""
    k1, k2, k3, k4 = jax.random.split(key, 4)
    bound1 = 1.0 / jnp.sqrt(num_features)
    w1 = jax.random.uniform(k1, (hidden, num_features), jnp.float32, -bound1, bound1)
    b1 = jax.random.uniform(k2, (hidden, 1), jnp.float32, -bound1, bound1)
    bound_o = 1.0 / jnp.sqrt(hidden)
    wo = jax.random.uniform(k3, (hidden, 1), jnp.float32, -bound_o, bound_o)
    bo = jax.random.uniform(k4, (1, 1), jnp.float32, -bound_o, bound_o)
    # TODO(synk): fc2 (nn.Linear(10, 10)) exists in the PyTorch module but is
    # never used in forward(); intentionally not materialized.
    return w1, b1, wo, bo


def reference_forward(x, w1, b1, wo, bo):
    h = jax.nn.sigmoid(x @ w1.T + b1[:, 0][None, :])
    return h @ wo + bo[0, 0]


if __name__ == "__main__":
    num_features = 32
    batch = 8

    key = jax.random.PRNGKey(0)
    k_x, k_p, k_x2 = jax.random.split(key, 3)
    w1, b1, wo, bo = init_params(k_p, num_features)

    # Small shape matching the module's intended use.
    x = jax.random.normal(k_x, (batch, num_features), jnp.float32)
    out = jax.block_until_ready(net_forward(x, w1, b1, wo, bo))
    ref = reference_forward(x, w1, b1, wo, bo)
    assert out.shape == (batch, 1)
    # bf16 input cast + approx reciprocal -> compare to f32 reference at ~1e-2.
    assert jnp.allclose(out, ref, atol=2e-2, rtol=2e-2), \
        float(jnp.max(jnp.abs(out - ref)))

    # Larger, non-divisible batch: exercises the batch grid + padding path.
    x2 = jax.random.normal(k_x2, (300, num_features), jnp.float32)
    out2 = jax.block_until_ready(net_forward(x2, w1, b1, wo, bo, block_rows=128))
    ref2 = reference_forward(x2, w1, b1, wo, bo)
    assert out2.shape == (300, 1)
    assert jnp.allclose(out2, ref2, atol=2e-2, rtol=2e-2), \
        float(jnp.max(jnp.abs(out2 - ref2)))

    print("KERNEL_OK")
</pallas_src>

<mosaic_0001>
module attributes {stable_mosaic.version = 11 : i64} {
  func.func @_net_kernel(%arg0: i32, %arg1: memref<128x32xbf16, #tpu.memory_space<vmem>>, %arg2: memref<10x32xbf16, #tpu.memory_space<vmem>>, %arg3: memref<10x1xf32, #tpu.memory_space<vmem>>, %arg4: memref<10x1xf32, #tpu.memory_space<vmem>>, %arg5: memref<1x1xf32, #tpu.memory_space<smem>>, %arg6: memref<1x1x128xf32, #tpu.memory_space<vmem>>) attributes {dimension_semantics = [#tpu.dimension_semantics<parallel>], iteration_bounds = array<i64: 1>, scalar_prefetch = 0 : i64, scratch_operands = 0 : i64, tpu.core_type = #tpu.core_type<tc>, window_params = [{transform_indices = @transform_0, window_bounds = array<i64: 128, 32>}, {pipeline_mode = #tpu.pipeline_mode<synchronous>, transform_indices = @transform_1, window_bounds = array<i64: 10, 32>}, {pipeline_mode = #tpu.pipeline_mode<synchronous>, transform_indices = @transform_2, window_bounds = array<i64: 10, 1>}, {pipeline_mode = #tpu.pipeline_mode<synchronous>, transform_indices = @transform_3, window_bounds = array<i64: 10, 1>}, {transform_indices = @transform_4, window_bounds = array<i64: 1, 1>}, {transform_indices = @transform_5, window_bounds = array<i64: 1, 1, 128>}]} {
    %c0 = arith.constant 0 : index
    %c0_0 = arith.constant 0 : index
    %0 = vector.load %arg2[%c0, %c0_0] : memref<10x32xbf16, #tpu.memory_space<vmem>>, vector<10x32xbf16>
    %c0_1 = arith.constant 0 : index
    %c0_2 = arith.constant 0 : index
    %1 = vector.load %arg1[%c0_1, %c0_2] : memref<128x32xbf16, #tpu.memory_space<vmem>>, vector<128x32xbf16>
    %cst = arith.constant dense<0.000000e+00> : vector<10x128xf32>
    %2 = tpu.matmul %0, %1, %cst {dimension_numbers = #tpu.dot_dimension_numbers<[1], [1], [0], [0], [0, 0, 1, 0], [], []>} : vector<10x32xbf16>, vector<128x32xbf16>, vector<10x128xf32> -> vector<10x128xf32>
    %c0_3 = arith.constant 0 : index
    %c0_4 = arith.constant 0 : index
    %3 = vector.load %arg3[%c0_3, %c0_4] : memref<10x1xf32, #tpu.memory_space<vmem>>, vector<10x1xf32>
    %4 = vector.broadcast %3 : vector<10x1xf32> to vector<10x128xf32>
    %5 = arith.addf %2, %4 : vector<10x128xf32>
    %cst_5 = arith.constant 0.000000e+00 : f32
    %6 = vector.broadcast %cst_5 : f32 to vector<10x128xf32>
    %7 = arith.subf %6, %5 : vector<10x128xf32>
    %8 = math.exp %7 : vector<10x128xf32>
    %cst_6 = arith.constant 1.000000e+00 : f32
    %9 = vector.broadcast %cst_6 : f32 to vector<10x128xf32>
    %10 = arith.addf %9, %8 : vector<10x128xf32>
    %11 = tpu.reciprocal %10 {approx = true} : vector<10x128xf32> -> vector<10x128xf32>
    %c0_7 = arith.constant 0 : index
    %c0_8 = arith.constant 0 : index
    %12 = vector.load %arg4[%c0_7, %c0_8] : memref<10x1xf32, #tpu.memory_space<vmem>>, vector<10x1xf32>
    %13 = vector.broadcast %12 : vector<10x1xf32> to vector<10x128xf32>
    %14 = arith.mulf %11, %13 : vector<10x128xf32>
    %cst_9 = arith.constant dense<0.000000e+00> : vector<128xf32>
    %15 = vector.multi_reduction <add>, %14, %cst_9 [0] : vector<10x128xf32> to vector<128xf32>
    %16 = vector.shape_cast %15 : vector<128xf32> to vector<1x128xf32>
    %c0_10 = arith.constant 0 : index
    %c0_11 = arith.constant 0 : index
    %17 = memref.load %arg5[%c0_10, %c0_11] : memref<1x1xf32, #tpu.memory_space<smem>>
    %18 = vector.broadcast %17 : f32 to vector<1x128xf32>
    %19 = arith.addf %16, %18 : vector<1x128xf32>
    %c0_12 = arith.constant 0 : index
    %c0_13 = arith.constant 0 : index
    %c0_14 = arith.constant 0 : index
    %20 = vector.load %arg6[%c0_12, %c0_13, %c0_14] : memref<1x1x128xf32, #tpu.memory_space<vmem>>, vector<1x1x128xf32>
    %21 = vector.shape_cast %20 : vector<1x1x128xf32> to vector<1x128xf32>
    %22 = vector.shape_cast %19 : vector<1x128xf32> to vector<1x1x128xf32>
    tpu.vector_store %arg6[%c0_12, %c0_13, %c0_14], %22 {strides = array<i32>} : memref<1x1x128xf32, #tpu.memory_space<vmem>>, vector<1x1x128xf32>,
    return
  }
  func.func @transform_0(%arg0: i32) -> (i32, i32) {
    %c0_i32 = arith.constant 0 : i32
    %c0_i32_0 = arith.constant 0 : i32
    return %arg0, %c0_i32 : i32, i32
  }
  func.func @transform_1(%arg0: i32) -> (i32, i32) {
    %c0_i32 = arith.constant 0 : i32
    %c0_i32_0 = arith.constant 0 : i32
    %c0_i32_1 = arith.constant 0 : i32
    return %c0_i32, %c0_i32_0 : i32, i32
  }
  func.func @transform_2(%arg0: i32) -> (i32, i32) {
    %c0_i32 = arith.constant 0 : i32
    %c0_i32_0 = arith.constant 0 : i32
    %c0_i32_1 = arith.constant 0 : i32
    return %c0_i32, %c0_i32_0 : i32, i32
  }
  func.func @transform_3(%arg0: i32) -> (i32, i32) {
    %c0_i32 = arith.constant 0 : i32
    %c0_i32_0 = arith.constant 0 : i32
    %c0_i32_1 = arith.constant 0 : i32
    return %c0_i32, %c0_i32_0 : i32, i32
  }
  func.func @transform_4(%arg0: i32) -> (i32, i32) {
    %c0_i32 = arith.constant 0 : i32
    %c0_i32_0 = arith.constant 0 : i32
    %c0_i32_1 = arith.constant 0 : i32
    return %c0_i32, %c0_i32_0 : i32, i32
  }
  func.func @transform_5(%arg0: i32) -> (i32, i32, i32) {
    %c0_i32 = arith.constant 0 : i32
    %c0_i32_0 = arith.constant 0 : i32
    %c0_i32_1 = arith.constant 0 : i32
    return %arg0, %c0_i32, %c0_i32_0 : i32, i32, i32
  }
}

</mosaic_0001>

<bundles_post_ra>
// kernel: tpu_custom_call.1
= control target key start
LH: loop header
LB: loop body
LE: loop exit
PB: predicated region body
PF: predicated region fallthrough
CT: control target
= control target key end

     0   :  { %v304_v1 = vmov 0.0   ;;  %vm98_vm0 = vcmask 261120   ;;  %vm305_vm1 = vmmov 0   ;;  %v306_v6 = vmov 0   ;;  %s401_s0 = inlined_call_operand.vmem [shape: bf16[128,32], index: 0, kind: input, shape index: {}]   ;;  %s402_s1 = inlined_call_operand.vmem [shape: bf16[10,32], index: 1, kind: input, shape index: {}]   ;;  %s403_s2 = inlined_call_operand.vmem [shape: f32[10,1], index: 2, kind: input, shape index: {}]   ;;  %s404_s3 = inlined_call_operand.vmem [shape: f32[10,1], index: 3, kind: input, shape index: {}]   ;;  %s405_s4 = inlined_call_operand.<no memory space> [shape: f32[1,1], index: 4, kind: input, shape index: {}]   ;;  %s406_s5 = inlined_call_operand.hbm [shape: f32[1,1,128], index: 5, kind: output, shape index: {}]  }
   0x1   :  { %v263_v0 = vld [vmem:[%s401_s0] sm:$0xff]   ;;  %237 = vmatprep.subr.bf16.mxu0 %v304_v1  ;;  %v264_v3 = vld [vmem:[%s401_s0 + $0x8] sm:$0xff]   ;;  %253 = vmatprep.mubr.msk.bf16.mxu0 %vm305_vm1, %v304_v1 }
   0x2   :  { %v103_v2 = vsel %vm98_vm0, %v263_v0, 0  ;;  %v106_v4 = vsel %vm98_vm0, %v264_v3, 0  ;;  %v42_v5 = vld [vmem:[%s403_s2 + $0x8] sm:$0x3]  ;;  %261 = vset.pattern.permute.xlu0 %v306_v6  ;;  %262 = vset.pattern.permute.xlu1 %v306_v6 }
   0x3   :  { %238 = vmatpush3.bf16.xpose.msra.mxu0 %v103_v2  ;;  %v178_v7 = vld [vmem:[%s404_s3 + $0x8] sm:$0x3]  ;;  %50 = vperm.xlu0 %261, %v42_v5  }
   0x4   :  { %239 = vmatprep.subr.bf16.mxu0 %v304_v1 }
   0xb   :  { %240 = vmatpush3.bf16.xpose.msra.mxu0 %v106_v4 }
   0xc   :  { %11 = vsyncpa [#allocation4], 0  ;;  %241 = vmatprep.subr.bf16.mxu0 %v304_v1  ;;  %v265_v8 = vld [vmem:[%s401_s0 + $0x10] sm:$0xff]   ;;  %v41_v9 = vld [vmem:[%s403_s2] sm:$0xff]  ;;  %186 = vperm.xlu1 %262, %v178_v7   ;;  %vm191_vm2 = vcmask 1041408   ;;  %v201_v52 = vstv %s405_s4  ;;  %s307_s17 = smov [#allocation3]  }
   0xd   :  { %v177_v10 = vld [vmem:[%s404_s3] sm:$0xff]  ;;  %45 = vperm.xlu0 %261, %v41_v9   ;;  %v109_v11 = vsel %vm98_vm0, %v265_v8, 0  ;;  %v266_v12 = vld [vmem:[%s401_s0 + $0x18] sm:$0xff]   ;;  %v268_v16 = vld [vmem:[%s401_s0 + $0x28] sm:$0xff]   ;;  %s210_s18 = sshll.u32 %s307_s17, 4  ;;  %s211_s18 = int_to_ptr.vmem [resolvable:$true] %s210_s18 }
   0xe   :  { %v112_v13 = vsel %vm98_vm0, %v266_v12, 0  ;;  %v267_v14 = vld [vmem:[%s401_s0 + $0x20] sm:$0xff]   ;;  %v118_v17 = vsel %vm98_vm0, %v268_v16, 0  ;;  %v269_v18 = vld [vmem:[%s401_s0 + $0x30] sm:$0xff]   ;;  %v270_v20 = vld [vmem:[%s401_s0 + $0x38] sm:$0xff]   ;;  %s280_s19 = scalar_lea.vmem %s211_s18, 16  ;;  %p285_p1 = scmp.lt.s32.totalorder %s211_s18, %s211_s18 }
   0xf   :  { %v115_v15 = vsel %vm98_vm0, %v267_v14, 0  ;;  %v121_v19 = vsel %vm98_vm0, %v269_v18, 0  ;;  %v124_v21 = vsel %vm98_vm0, %v270_v20, 0  ;;  %v271_v22 = vld [vmem:[%s402_s1] sm:$0x1f]   ;;  %p281_p0 = scmp.ne.s32.totalorder %s211_s18, %s280_s19  ;;  %s284_s20 = scalar_lea.vmem %s211_s18, 32 }
  0x10   :  { %181 = vperm.xlu1 %262, %v177_v10   ;;  %p286_p2 = scmp.lt.s32.totalorder %s284_s20, %s280_s19 }
  0x12   :  { %p287_p3 = por %p286_p2, %p285_p1 }
  0x13   :  { %242 = vmatpush3.bf16.xpose.msra.mxu0 %v109_v11 }
  0x14   :  { %243 = vmatprep.subr.bf16.mxu0 %v304_v1  ;;  %p288_p4 = pnand %p287_p3, %p281_p0 }
  0x1b   :  { %244 = vmatpush3.bf16.xpose.msra.mxu0 %v112_v13 }
  0x1c   :  { %245 = vmatprep.subr.bf16.mxu0 %v304_v1 }
  0x23   :  { %246 = vmatpush3.bf16.xpose.msra.mxu0 %v115_v15 }
  0x24   :  { %247 = vmatprep.subr.bf16.mxu0 %v304_v1 }
  0x2b   :  { %248 = vmatpush3.bf16.xpose.msra.mxu0 %v118_v17 }
  0x2c   :  { %249 = vmatprep.subr.bf16.mxu0 %v304_v1 }
  0x33   :  { %250 = vmatpush3.bf16.xpose.msra.mxu0 %v121_v19 }
  0x34   :  { %251 = vmatprep.subr.bf16.mxu0 %v304_v1 }
  0x3b   :  { %252 = vmatpush3.bf16.xpose.msra.mxu0 %v124_v21 }
  0x42   :  { %254 = vmatmul.mubr.msk.bf16.vlgmr.msra.gmra.mrb[0].mxu0 %vm98_vm0, %v271_v22 }
  0x82   :  { %v51_v23 = vpop.permute.xlu0 %50 }
  0x8b   :  { %v187_v39 = vpop.permute.xlu1 %186 }
  0x8c   :  { %v46_v24 = vpop.permute.xlu0 %45 }
  0x8f   :  { %v182_v41 = vpop.permute.xlu1 %181 }
 0x115   :  { %v160_v25 = vpop.f32.mrb[0].mxu0 }
 0x116   :  { %v161_v26 = vadd.f32 %v160_v25, %v46_v24  ;;  %v255_v27 = vpop.f32.mrb[1].mxu0 }
 0x117   :  { %v163_v28 = vpop.f32.mrb[2].mxu0 }
 0x118   :  { %v167_v29 = vsub.f32 0.0, %v161_v26  ;;  %v164_v30 = vadd.f32 %v163_v28, %v51_v23  ;;  %v256_v31 = vpop.f32.mrb[3].mxu0 }
 0x11a   :  { %v169_v32 = vmul.f32 1.442695, %v167_v29  ;;  %v168_v33 = vsub.f32 0.0, %v164_v30 }
 0x11c   :  { %272 = vpow2.f32 %v169_v32  ;;  %v171_v34 = vmul.f32 1.442695, %v168_v33 }
 0x11e   :  { %274 = vpow2.f32 %v171_v34 }
 0x126   :  { %v273_v35 = vpop.eup %272 }
 0x127   :  { %v173_v36 = vadd.f32 1.0, %v273_v35 }
 0x128   :  { %v275_v37 = vpop.eup %274 }
 0x129   :  { %v174_v38 = vadd.f32 1.0, %v275_v37  ;;  %276 = vrcp.f32 %v173_v36 }
 0x12b   :  { %278 = vrcp.f32 %v174_v38 }
 0x133   :  { %v277_v40 = vpop.eup %276 }
 0x134   :  { %v189_v44 = vmul.f32 %v277_v40, %v182_v41 }
 0x135   :  { %v279_v42 = vpop.eup %278 }
 0x136   :  { %v190_v43 = vmul.f32 %v279_v42, %v187_v39 }
 0x138   :  { %v192_v45 = vsel %vm191_vm2, %v190_v43, 0.0 }
 0x139   :  { %v193_v46 = vadd.f32 %v192_v45, %v189_v44 }
 0x13b   :  { %v194_v47 = vrot.slane %v193_v46, 4 }
 0x13d   :  { %v195_v48 = vadd.f32 %v194_v47, %v193_v46 }
 0x13f   :  { %v196_v49 = vrot.slane %v195_v48, 2 }
 0x141   :  { %v197_v50 = vadd.f32 %v196_v49, %v195_v48 }
 0x143   :  { %v198_v51 = vrot.slane %v197_v50, 1 }
 0x145   :  { %v199_v53 = vadd.f32 %v198_v51, %v197_v50 }
 0x147   :  { %v202_v54 = vadd.f32 %v201_v52, %v199_v53 }
 0x149   :  { %203 = vst [vmem:[#allocation3] sm:$0x1] %v202_v54 }
 0x14a   :  { %291 = shalt.err (!%p288_p4)
}
 0x14b   :  { %s292_s23 = scalar_lea.hbm %s406_s5, 16 }
 0x14c   :  { %p293_p5 = scmp.ne.s32.totalorder %s406_s5, %s292_s23  ;;  %p296_p6 = scmp.lt.u32.totalorder %s292_s23, %s406_s5 }
 0x14e   :  { %p298_p7 = pnand %p296_p6, %p293_p5 }
 0x150   :  { %301 = shalt.err (!%p298_p7)
}
 0x151   :  { %213 = dma.vmem_to_hbm [thread:$0]  %s211_s18, 16, %s406_s5, [#allocation4]  }
 0x152   :  { %302 = dma.done.wait [#allocation4], 16  }
 0x153   :  { %303 = vsyncadd [#allocation4], 4294967280 }
 0x154   :  { %217 = vsyncpa [#allocation4], 1 }

</bundles_post_ra>
